<compile_context>
chip_gen: v7x
topology: tpu7x:2x2x1
jax: 0.10.0
libtpu: 0.0.40
codegen_flags: <defaults>
</compile_context>

<pallas_src>
import functools

import jax
import jax.numpy as jnp
from jax.experimental import pallas as pl
from jax.experimental.pallas import tpu as pltpu


def _round_up(x, m):
    return ((x + m - 1) // m) * m


def _ial_loss_kernel(s_ref, t_ref, out_ref, s_nrm, t_nrm, acc,
                     *, tau, alpha, zoom, norm, n_src, n_valid, tq):
    LARGE_NUM = 1e9
    step = pl.program_id(0)

    # ---- step-0 preprocessing: normalize, fold sqrt(1/tau), cast, zero acc ----
    @pl.when(step == 0)
    def _prep():
        scale = (1.0 / tau) ** 0.5          # fold 1/tau into both operands

        def normalize_into(x_ref, dst):
            x = x_ref[...].astype(jnp.float32)
            if norm:
                ss = jnp.sum(x * x, axis=1, keepdims=True)
                # x / max(||x||, 1e-12)  ==  x * rsqrt(max(||x||^2, 1e-24))
                inv = jax.lax.rsqrt(jnp.maximum(ss, 1e-24))
                x = x * inv
            dst[...] = (x * scale).astype(dst.dtype)

        normalize_into(s_ref, s_nrm)
        normalize_into(t_ref, t_nrm)
        acc[...] = jnp.zeros_like(acc)

    # ---- per-tile Gram rows: (tq, 2B_pad) slabs of P and Q ----
    r0 = pl.multiple_of(step * tq, tq)
    s_rows = s_nrm[pl.ds(r0, tq), :]
    t_rows = t_nrm[pl.ds(r0, tq), :]

    nt_dims = (((1,), (1,)), ((), ()))      # A @ B^T without an explicit transpose
    p = jax.lax.dot_general(s_rows, s_nrm[...], nt_dims,
                            preferred_element_type=jnp.float32)
    q = jax.lax.dot_general(t_rows, t_nrm[...], nt_dims,
                            preferred_element_type=jnp.float32)

    r_pad = p.shape[1]
    col = jax.lax.broadcasted_iota(jnp.int32, (tq, r_pad), 1)
    row = jax.lax.broadcasted_iota(jnp.int32, (tq, r_pad), 0) + r0
    dead = (col == row) | (col >= n_valid)  # self-similarity diag + padded cols
    p = jnp.where(dead, p - LARGE_NUM, p)
    q = jnp.where(dead, q - LARGE_NUM, q)

    # Row-wise log_softmax(p) / softmax(q) over the full 2B columns (the concat
    # ordering of the reference does not affect the row sums).
    pm = jnp.max(p, axis=1, keepdims=True)
    p_lse = pm + jnp.log(jnp.sum(jnp.exp(p - pm), axis=1, keepdims=True))
    qm = jnp.max(q, axis=1, keepdims=True)
    eq = jnp.exp(q - qm)                    # reused for both Z_q and softmax(q)
    qz = jnp.sum(eq, axis=1, keepdims=True)
    qs = eq * (1.0 / qz)
    # kl = qs*(log qs - log_softmax(p)) = qs*((q - qm - log qz) - (p - p_lse));
    # masked entries have qs == 0 exactly, and multiply finite terms -> 0
    # (matches the PyTorch kl_div xlogy convention).
    c = p_lse - qm - jnp.log(qz)            # (tq, 1)
    kl_row = jnp.sum(qs * ((q - p) + c), axis=1, keepdims=True)

    # Row weights: alpha for loss_a rows (< B), 1-alpha for loss_b rows, 0 pad.
    grow = jax.lax.broadcasted_iota(jnp.int32, (tq, 1), 0) + r0
    w = jnp.where(grow < n_src, alpha,
                  jnp.where(grow < n_valid, 1.0 - alpha, 0.0)).astype(jnp.float32)

    acc[...] = acc[...] + jnp.sum(w * kl_row)
    # Write the (scaled) running sum every step; the final step leaves the
    # correct value regardless of output write-back policy.
    out_ref[...] = acc[...] * (zoom / float(n_src * 2 * n_src))


def ial_loss(src_emb, tar_emb, train_links, *, tau=0.05, modal_weight=0.5,
             zoom=0.1, norm=True, row_tile=128, use_bf16=False):
    # Gather linked rows (glue; row-wise normalization inside the kernel is
    # equivalent to normalizing before gathering).
    szi = jnp.take(src_emb, train_links[:, 0], axis=0)
    szj = jnp.take(src_emb, train_links[:, 1], axis=0)
    tzi = jnp.take(tar_emb, train_links[:, 0], axis=0)
    tzj = jnp.take(tar_emb, train_links[:, 1], axis=0)
    B, D = szi.shape

    S = jnp.concatenate([szi, szj], axis=0).astype(jnp.float32)  # (2B, D)
    T = jnp.concatenate([tzi, tzj], axis=0).astype(jnp.float32)

    R = 2 * B
    tq = _round_up(min(row_tile, _round_up(R, 8)), 8)
    R_pad = _round_up(R, tq)
    D_pad = _round_up(D, 128)
    S = jnp.pad(S, ((0, R_pad - R), (0, D_pad - D)))
    T = jnp.pad(T, ((0, R_pad - R), (0, D_pad - D)))
    n_tiles = R_pad // tq

    # Matmul operand dtype. bf16 cuts MXU pass count ~3x but perturbs the
    # similarities; keep f32 by default to preserve the module's numerics.
    op_dtype = jnp.bfloat16 if use_bf16 else jnp.float32

    kernel = functools.partial(
        _ial_loss_kernel, tau=tau, alpha=modal_weight, zoom=zoom, norm=norm,
        n_src=B, n_valid=R, tq=tq)

    # VMEM budget: raw inputs (possibly double-buffered) + normalized scratch
    # + P/Q row-tile temporaries.  Clamp so it also fits v7x's 64 MiB VMEM.
    itemsize = jnp.dtype(op_dtype).itemsize
    vmem_est = (4 * R_pad * D_pad * 4          # 2 inputs x 2 buffers, f32
                + 2 * R_pad * D_pad * itemsize  # normalized scratch
                + 8 * tq * R_pad * 4            # P/Q/exp temporaries
                + (1 << 20))
    vmem_limit = int(min(max(vmem_est, 32 << 20), 96 << 20))

    out = pl.pallas_call(
        kernel,
        out_shape=jax.ShapeDtypeStruct((1, 1), jnp.float32),
        grid_spec=pltpu.PrefetchScalarGridSpec(
            num_scalar_prefetch=0,
            grid=(n_tiles,),
            in_specs=[pl.BlockSpec((R_pad, D_pad), lambda i: (0, 0)),
                      pl.BlockSpec((R_pad, D_pad), lambda i: (0, 0))],
            out_specs=pl.BlockSpec((1, 1), lambda i: (0, 0)),
            scratch_shapes=[pltpu.VMEM((R_pad, D_pad), op_dtype),   # S normed
                            pltpu.VMEM((R_pad, D_pad), op_dtype),   # T normed
                            pltpu.VMEM((1, 1), jnp.float32)]),      # KL accum
        compiler_params=pltpu.CompilerParams(
            # TODO(synk): for v7x megacore, switch to per-tile partial outputs
            # with a "parallel" axis; the scalar accumulator needs "arbitrary".
            dimension_semantics=("arbitrary",),
            vmem_limit_bytes=vmem_limit),
    )(S, T)
    return out[0, 0]


def _ref_ial_loss(src_emb, tar_emb, train_links, *, tau=0.05, alpha=0.5,
                  zoom=0.1):
    # Pure-JAX reference mirroring the PyTorch forward.
    def l2norm(x):
        n = jnp.sqrt(jnp.sum(x * x, axis=1, keepdims=True))
        return x / jnp.maximum(n, 1e-12)

    s, t = l2norm(src_emb), l2norm(tar_emb)
    szi, szj = s[train_links[:, 0]], s[train_links[:, 1]]
    tzi, tzj = t[train_links[:, 0]], t[train_links[:, 1]]
    B = szi.shape[0]
    eye = jnp.eye(B, dtype=jnp.float32) * 1e9

    def sim(a, b):
        return (a @ b.T) / tau

    p_ab = jnp.concatenate([sim(szi, szj), sim(szi, szi) - eye], axis=1)
    p_ba = jnp.concatenate([sim(szj, szi), sim(szj, szj) - eye], axis=1)
    q_ab = jnp.concatenate([sim(tzi, tzj), sim(tzi, tzi) - eye], axis=1)
    q_ba = jnp.concatenate([sim(tzj, tzi), sim(tzj, tzj) - eye], axis=1)

    def kl_mean(p, q):
        logp = jax.nn.log_softmax(p, axis=1)
        qs = jax.nn.softmax(q, axis=1)
        qlogq = jnp.where(qs > 0, qs * jnp.log(jnp.where(qs > 0, qs, 1.0)), 0.0)
        return jnp.mean(qlogq - qs * logp)

    return zoom * (alpha * kl_mean(p_ab, q_ab) + (1 - alpha) * kl_mean(p_ba, q_ba))


if __name__ == "__main__":
    key = jax.random.PRNGKey(0)
    k1, k2, k3 = jax.random.split(key, 3)

    N, D, B = 16, 32, 8                     # entities, embed dim, num links
    src_emb = jax.random.normal(k1, (N, D), dtype=jnp.float32)
    tar_emb = jax.random.normal(k2, (N, D), dtype=jnp.float32)
    train_links = jax.random.randint(k3, (B, 2), 0, N, dtype=jnp.int32)

    loss = ial_loss(src_emb, tar_emb, train_links,
                    tau=0.05, modal_weight=0.5, zoom=0.1, norm=True)
    loss = jax.block_until_ready(loss)

    ref = _ref_ial_loss(src_emb, tar_emb, train_links,
                        tau=0.05, alpha=0.5, zoom=0.1)
    ref = jax.block_until_ready(ref)

    assert jnp.isfinite(loss), f"non-finite loss: {loss}"
    assert jnp.allclose(loss, ref, rtol=1e-4, atol=1e-5), (loss, ref)
    print("KERNEL_OK")
</pallas_src>

<mosaic_0001>
module attributes {stable_mosaic.version = 11 : i64} {
  func.func @_ial_loss_kernel(%arg0: i32, %arg1: memref<16x128xf32, #tpu.memory_space<vmem>>, %arg2: memref<16x128xf32, #tpu.memory_space<vmem>>, %arg3: memref<1x1xf32, #tpu.memory_space<vmem>>, %arg4: memref<16x128xf32, #tpu.memory_space<vmem>>, %arg5: memref<16x128xf32, #tpu.memory_space<vmem>>, %arg6: memref<1x1xf32, #tpu.memory_space<vmem>>) attributes {dimension_semantics = [#tpu.dimension_semantics<arbitrary>], iteration_bounds = array<i64: 1>, scalar_prefetch = 0 : i64, scratch_operands = 3 : i64, tpu.core_type = #tpu.core_type<tc>, window_params = [{pipeline_mode = #tpu.pipeline_mode<synchronous>, transform_indices = @transform_0, window_bounds = array<i64: 16, 128>}, {pipeline_mode = #tpu.pipeline_mode<synchronous>, transform_indices = @transform_1, window_bounds = array<i64: 16, 128>}, {pipeline_mode = #tpu.pipeline_mode<synchronous>, transform_indices = @transform_2, window_bounds = array<i64: 1, 1>}]} {
    %c0_i32 = arith.constant 0 : i32
    %0 = arith.cmpi eq, %arg0, %c0_i32 : i32
    %1 = arith.extui %0 : i1 to i32
    %c0_i32_0 = arith.constant 0 : i32
    %2 = arith.cmpi ne, %1, %c0_i32_0 : i32
    scf.if %2 {
      %c0_30 = arith.constant 0 : index
      %c0_31 = arith.constant 0 : index
      %81 = vector.load %arg1[%c0_30, %c0_31] : memref<16x128xf32, #tpu.memory_space<vmem>>, vector<16x128xf32>
      %82 = arith.mulf %81, %81 : vector<16x128xf32>
      %cst_32 = arith.constant dense<0.000000e+00> : vector<16xf32>
      %83 = vector.multi_reduction <add>, %82, %cst_32 [1] : vector<16x128xf32> to vector<16xf32>
      %84 = vector.shape_cast %83 : vector<16xf32> to vector<16x1xf32>
      %cst_33 = arith.constant 1.000000e-24 : f32
      %85 = vector.broadcast %cst_33 : f32 to vector<16x1xf32>
      %86 = arith.maximumf %84, %85 : vector<16x1xf32>
      %87 = math.rsqrt %86 : vector<16x1xf32>
      %88 = vector.broadcast %87 : vector<16x1xf32> to vector<16x128xf32>
      %89 = arith.mulf %81, %88 : vector<16x128xf32>
      %cst_34 = arith.constant 4.47213602 : f32
      %90 = vector.broadcast %cst_34 : f32 to vector<16x128xf32>
      %91 = arith.mulf %89, %90 : vector<16x128xf32>
      %c0_35 = arith.constant 0 : index
      %c0_36 = arith.constant 0 : index
      %92 = vector.load %arg4[%c0_35, %c0_36] : memref<16x128xf32, #tpu.memory_space<vmem>>, vector<16x128xf32>
      tpu.vector_store %arg4[%c0_35, %c0_36], %91 {strides = array<i32>} : memref<16x128xf32, #tpu.memory_space<vmem>>, vector<16x128xf32>,
      %c0_37 = arith.constant 0 : index
      %c0_38 = arith.constant 0 : index
      %93 = vector.load %arg2[%c0_37, %c0_38] : memref<16x128xf32, #tpu.memory_space<vmem>>, vector<16x128xf32>
      %94 = arith.mulf %93, %93 : vector<16x128xf32>
      %cst_39 = arith.constant dense<0.000000e+00> : vector<16xf32>
      %95 = vector.multi_reduction <add>, %94, %cst_39 [1] : vector<16x128xf32> to vector<16xf32>
      %96 = vector.shape_cast %95 : vector<16xf32> to vector<16x1xf32>
      %cst_40 = arith.constant 1.000000e-24 : f32
      %97 = vector.broadcast %cst_40 : f32 to vector<16x1xf32>
      %98 = arith.maximumf %96, %97 : vector<16x1xf32>
      %99 = math.rsqrt %98 : vector<16x1xf32>
      %100 = vector.broadcast %99 : vector<16x1xf32> to vector<16x128xf32>
      %101 = arith.mulf %93, %100 : vector<16x128xf32>
      %cst_41 = arith.constant 4.47213602 : f32
      %102 = vector.broadcast %cst_41 : f32 to vector<16x128xf32>
      %103 = arith.mulf %101, %102 : vector<16x128xf32>
      %c0_42 = arith.constant 0 : index
      %c0_43 = arith.constant 0 : index
      %104 = vector.load %arg5[%c0_42, %c0_43] : memref<16x128xf32, #tpu.memory_space<vmem>>, vector<16x128xf32>
      tpu.vector_store %arg5[%c0_42, %c0_43], %103 {strides = array<i32>} : memref<16x128xf32, #tpu.memory_space<vmem>>, vector<16x128xf32>,
      %cst_44 = arith.constant 0.000000e+00 : f32
      %105 = vector.broadcast %cst_44 : f32 to vector<1x1xf32>
      %c0_45 = arith.constant 0 : index
      %c0_46 = arith.constant 0 : index
      %106 = vector.load %arg6[%c0_45, %c0_46] : memref<1x1xf32, #tpu.memory_space<vmem>>, vector<1x1xf32>
      tpu.vector_store %arg6[%c0_45, %c0_46], %105 {strides = array<i32>} : memref<1x1xf32, #tpu.memory_space<vmem>>, vector<1x1xf32>,
    } else {
    }
    %c16_i32 = arith.constant 16 : i32
    %3 = arith.muli %arg0, %c16_i32 : i32
    %4 = tpu.assume_multiple %3, 16 : i32
    %5 = arith.index_cast %4 : i32 to index
    %c0 = arith.constant 0 : index
    %6 = vector.load %arg4[%5, %c0] : memref<16x128xf32, #tpu.memory_space<vmem>>, vector<16x128xf32>
    %7 = arith.index_cast %4 : i32 to index
    %c0_1 = arith.constant 0 : index
    %8 = vector.load %arg5[%7, %c0_1] : memref<16x128xf32, #tpu.memory_space<vmem>>, vector<16x128xf32>
    %c0_2 = arith.constant 0 : index
    %c0_3 = arith.constant 0 : index
    %9 = vector.load %arg4[%c0_2, %c0_3] : memref<16x128xf32, #tpu.memory_space<vmem>>, vector<16x128xf32>
    %cst = arith.constant dense<0.000000e+00> : vector<16x16xf32>
    %10 = tpu.matmul %6, %9, %cst {dimension_numbers = #tpu.dot_dimension_numbers<[1], [1], [0], [0], [0, 0, 1, 0], [], []>} : vector<16x128xf32>, vector<16x128xf32>, vector<16x16xf32> -> vector<16x16xf32>
    %c0_4 = arith.constant 0 : index
    %c0_5 = arith.constant 0 : index
    %11 = vector.load %arg5[%c0_4, %c0_5] : memref<16x128xf32, #tpu.memory_space<vmem>>, vector<16x128xf32>
    %cst_6 = arith.constant dense<0.000000e+00> : vector<16x16xf32>
    %12 = tpu.matmul %8, %11, %cst_6 {dimension_numbers = #tpu.dot_dimension_numbers<[1], [1], [0], [0], [0, 0, 1, 0], [], []>} : vector<16x128xf32>, vector<16x128xf32>, vector<16x16xf32> -> vector<16x16xf32>
    %13 = tpu.iota {dimensions = array<i32: 1>} : vector<16x16xi32>
    %14 = tpu.iota {dimensions = array<i32: 0>} : vector<16x16xi32>
    %15 = vector.broadcast %4 : i32 to vector<16x16xi32>
    %16 = arith.addi %14, %15 : vector<16x16xi32>
    %17 = arith.cmpi eq, %13, %16 : vector<16x16xi32>
    %c16_i32_7 = arith.constant 16 : i32
    %18 = vector.broadcast %c16_i32_7 : i32 to vector<16x16xi32>
    %19 = arith.cmpi sge, %13, %18 : vector<16x16xi32>
    %20 = arith.ori %17, %19 : vector<16x16xi1>
    %cst_8 = arith.constant 1.000000e+09 : f32
    %21 = vector.broadcast %cst_8 : f32 to vector<16x16xf32>
    %22 = arith.subf %10, %21 : vector<16x16xf32>
    %23 = arith.select %20, %22, %10 : vector<16x16xi1>, vector<16x16xf32>
    %cst_9 = arith.constant 1.000000e+09 : f32
    %24 = vector.broadcast %cst_9 : f32 to vector<16x16xf32>
    %25 = arith.subf %12, %24 : vector<16x16xf32>
    %26 = arith.select %20, %25, %12 : vector<16x16xi1>, vector<16x16xf32>
    %cst_10 = arith.constant dense<0xFF800000> : vector<16xf32>
    %27 = vector.multi_reduction <maximumf>, %23, %cst_10 [1] : vector<16x16xf32> to vector<16xf32>
    %28 = vector.shape_cast %27 : vector<16xf32> to vector<16x1xf32>
    %29 = vector.broadcast %28 : vector<16x1xf32> to vector<16x16xf32>
    %30 = arith.subf %23, %29 : vector<16x16xf32>
    %31 = math.exp %30 : vector<16x16xf32>
    %cst_11 = arith.constant dense<0.000000e+00> : vector<16xf32>
    %32 = vector.multi_reduction <add>, %31, %cst_11 [1] : vector<16x16xf32> to vector<16xf32>
    %33 = vector.shape_cast %32 : vector<16xf32> to vector<16x1xf32>
    %34 = math.log %33 : vector<16x1xf32>
    %35 = arith.addf %28, %34 : vector<16x1xf32>
    %cst_12 = arith.constant dense<0xFF800000> : vector<16xf32>
    %36 = vector.multi_reduction <maximumf>, %26, %cst_12 [1] : vector<16x16xf32> to vector<16xf32>
    %37 = vector.shape_cast %36 : vector<16xf32> to vector<16x1xf32>
    %38 = vector.broadcast %37 : vector<16x1xf32> to vector<16x16xf32>
    %39 = arith.subf %26, %38 : vector<16x16xf32>
    %40 = math.exp %39 : vector<16x16xf32>
    %cst_13 = arith.constant dense<0.000000e+00> : vector<16xf32>
    %41 = vector.multi_reduction <add>, %40, %cst_13 [1] : vector<16x16xf32> to vector<16xf32>
    %42 = vector.shape_cast %41 : vector<16xf32> to vector<16x1xf32>
    %cst_14 = arith.constant 1.000000e+00 : f32
    %43 = vector.broadcast %cst_14 : f32 to vector<16x1xf32>
    %44 = arith.divf %43, %42 : vector<16x1xf32>
    %45 = vector.broadcast %44 : vector<16x1xf32> to vector<16x16xf32>
    %46 = arith.mulf %40, %45 : vector<16x16xf32>
    %47 = arith.subf %35, %37 : vector<16x1xf32>
    %48 = math.log %42 : vector<16x1xf32>
    %49 = arith.subf %47, %48 : vector<16x1xf32>
    %50 = arith.subf %26, %23 : vector<16x16xf32>
    %51 = vector.broadcast %49 : vector<16x1xf32> to vector<16x16xf32>
    %52 = arith.addf %50, %51 : vector<16x16xf32>
    %53 = arith.mulf %46, %52 : vector<16x16xf32>
    %cst_15 = arith.constant dense<0.000000e+00> : vector<16xf32>
    %54 = vector.multi_reduction <add>, %53, %cst_15 [1] : vector<16x16xf32> to vector<16xf32>
    %55 = vector.shape_cast %54 : vector<16xf32> to vector<16x1xf32>
    %56 = tpu.iota {dimensions = array<i32: 0>} : vector<16x1xi32>
    %57 = vector.broadcast %4 : i32 to vector<16x1xi32>
    %58 = arith.addi %56, %57 : vector<16x1xi32>
    %c8_i32 = arith.constant 8 : i32
    %59 = vector.broadcast %c8_i32 : i32 to vector<16x1xi32>
    %60 = arith.cmpi slt, %58, %59 : vector<16x1xi32>
    %c16_i32_16 = arith.constant 16 : i32
    %61 = vector.broadcast %c16_i32_16 : i32 to vector<16x1xi32>
    %62 = arith.cmpi slt, %58, %61 : vector<16x1xi32>
    %cst_17 = arith.constant 5.000000e-01 : f32
    %cst_18 = arith.constant 0.000000e+00 : f32
    %63 = vector.broadcast %cst_17 : f32 to vector<16x1xf32>
    %64 = vector.broadcast %cst_18 : f32 to vector<16x1xf32>
    %65 = arith.select %62, %63, %64 : vector<16x1xi1>, vector<16x1xf32>
    %cst_19 = arith.constant 5.000000e-01 : f32
    %66 = vector.broadcast %cst_19 : f32 to vector<16x1xf32>
    %67 = arith.select %60, %66, %65 : vector<16x1xi1>, vector<16x1xf32>
    %c0_20 = arith.constant 0 : index
    %c0_21 = arith.constant 0 : index
    %68 = vector.load %arg6[%c0_20, %c0_21] : memref<1x1xf32, #tpu.memory_space<vmem>>, vector<1x1xf32>
    %69 = arith.mulf %67, %55 : vector<16x1xf32>
    %70 = vector.shape_cast %69 : vector<16x1xf32> to vector<1x16x1xf32>
    %cst_22 = arith.constant dense<0.000000e+00> : vector<1xf32>
    %71 = vector.multi_reduction <add>, %70, %cst_22 [1, 2] : vector<1x16x1xf32> to vector<1xf32>
    %72 = vector.shape_cast %71 : vector<1xf32> to vector<1x1x1xf32>
    %73 = vector.extract %72[0, 0, 0] : f32 from vector<1x1x1xf32>
    %74 = vector.broadcast %73 : f32 to vector<1x1xf32>
    %75 = arith.addf %68, %74 : vector<1x1xf32>
    %c0_23 = arith.constant 0 : index
    %c0_24 = arith.constant 0 : index
    %76 = vector.load %arg6[%c0_23, %c0_24] : memref<1x1xf32, #tpu.memory_space<vmem>>, vector<1x1xf32>
    tpu.vector_store %arg6[%c0_23, %c0_24], %75 {strides = array<i32>} : memref<1x1xf32, #tpu.memory_space<vmem>>, vector<1x1xf32>,
    %c0_25 = arith.constant 0 : index
    %c0_26 = arith.constant 0 : index
    %77 = vector.load %arg6[%c0_25, %c0_26] : memref<1x1xf32, #tpu.memory_space<vmem>>, vector<1x1xf32>
    %cst_27 = arith.constant 7.812500e-04 : f32
    %78 = vector.broadcast %cst_27 : f32 to vector<1x1xf32>
    %79 = arith.mulf %77, %78 : vector<1x1xf32>
    %c0_28 = arith.constant 0 : index
    %c0_29 = arith.constant 0 : index
    %80 = vector.load %arg3[%c0_28, %c0_29] : memref<1x1xf32, #tpu.memory_space<vmem>>, vector<1x1xf32>
    tpu.vector_store %arg3[%c0_28, %c0_29], %79 {strides = array<i32>} : memref<1x1xf32, #tpu.memory_space<vmem>>, vector<1x1xf32>,
    return
  }
  func.func @transform_0(%arg0: i32) -> (i32, i32) {
    %c0_i32 = arith.constant 0 : i32
    %c0_i32_0 = arith.constant 0 : i32
    %c0_i32_1 = arith.constant 0 : i32
    return %c0_i32, %c0_i32_0 : i32, i32
  }
  func.func @transform_1(%arg0: i32) -> (i32, i32) {
    %c0_i32 = arith.constant 0 : i32
    %c0_i32_0 = arith.constant 0 : i32
    %c0_i32_1 = arith.constant 0 : i32
    return %c0_i32, %c0_i32_0 : i32, i32
  }
  func.func @transform_2(%arg0: i32) -> (i32, i32) {
    %c0_i32 = arith.constant 0 : i32
    %c0_i32_0 = arith.constant 0 : i32
    %c0_i32_1 = arith.constant 0 : i32
    return %c0_i32, %c0_i32_0 : i32, i32
  }
}

</mosaic_0001>

<bundles_post_ra>
// kernel: tpu_custom_call.1
= control target key start
LH: loop header
LB: loop body
LE: loop exit
PB: predicated region body
PF: predicated region fallthrough
CT: control target
= control target key end

     0   :  { %7 = vsyncpa [#allocation6], 0  ;;  %s612_s0 = inlined_call_operand.hbm [shape: f32[16,128], index: 0, kind: input, shape index: {}]   ;;  %s613_s1 = inlined_call_operand.hbm [shape: f32[16,128], index: 1, kind: input, shape index: {}]   ;;  %s614_s2 = inlined_call_operand.hbm [shape: f32[1,1], index: 2, kind: output, shape index: {}]  }
   0x1   :  { %8 = vsyncpa [#allocation9], 0 }
   0x2   :  { %9 = vsyncpa [#allocation7], 0  ;;  %s522_s9 = smov [#allocation5]   ;;  %s450_s13 = scalar_lea.hbm %s612_s0, 256 }
   0x3   :  { %s15_s10 = sshll.u32 %s522_s9, 4  ;;  %p451_p0 = scmp.ne.s32.totalorder %s612_s0, %s450_s13  ;;  %s16_s10 = int_to_ptr.vmem [resolvable:$true] %s15_s10 }
   0x4   :  { %p454_p1 = scmp.lt.u32.totalorder %s450_s13, %s612_s0 }
   0x6   :  { %p456_p2 = pnand %p454_p1, %p451_p0 }
   0x8   :  { %459 = shalt.err (!%p456_p2)
}
   0x9   :  { %s460_s18 = scalar_lea.vmem %s16_s10, 256  ;;  %p465_p4 = scmp.lt.s32.totalorder %s16_s10, %s16_s10 }
   0xa   :  { %p461_p3 = scmp.ne.s32.totalorder %s16_s10, %s460_s18  ;;  %p466_p5 = scmp.lt.s32.totalorder %s460_s18, %s460_s18 }
   0xc   :  { %p467_p6 = por %p466_p5, %p465_p4 }
   0xe   :  { %p468_p7 = pnand %p467_p6, %p461_p3 }
  0x10   :  { %471 = shalt.err (!%p468_p7)
}
  0x11   :  { %s523_s19 = smov 128   ;;  %s524_s20 = smov 8  }
  0x12   :  { %21 = dma.hbm_to_vmem [thread:$0]  %s612_s0, 256, %s16_s10, [#allocation6], %s523_s19, %s523_s19, %s524_s20  }
  0x13   :  { %s525_s23 = smov [#allocation8]   ;;  %s472_s27 = scalar_lea.hbm %s613_s1, 256 }
  0x14   :  { %s27_s24 = sshll.u32 %s525_s23, 4  ;;  %p473_p8 = scmp.ne.s32.totalorder %s613_s1, %s472_s27  ;;  %s28_s24 = int_to_ptr.vmem [resolvable:$true] %s27_s24 }
  0x15   :  { %p476_p9 = scmp.lt.u32.totalorder %s472_s27, %s613_s1 }
  0x17   :  { %p478_p10 = pnand %p476_p9, %p473_p8 }
  0x19   :  { %481 = shalt.err (!%p478_p10)
}
  0x1a   :  { %s482_s4 = scalar_lea.vmem %s28_s24, 256  ;;  %p487_p12 = scmp.lt.s32.totalorder %s28_s24, %s28_s24 }
  0x1b   :  { %p483_p11 = scmp.ne.s32.totalorder %s28_s24, %s482_s4  ;;  %p488_p13 = scmp.lt.s32.totalorder %s482_s4, %s482_s4 }
  0x1d   :  { %p489_p0 = por %p488_p13, %p487_p12 }
  0x1f   :  { %p490_p1 = pnand %p489_p0, %p483_p11 }
  0x21   :  { %493 = shalt.err (!%p490_p1)
}
  0x22   :  { %33 = dma.hbm_to_vmem [thread:$0]  %s613_s1, 256, %s28_s24, [#allocation9], %s523_s19, %s523_s19, %s524_s20  }
  0x23   :  { %516 = dma.done.wait [#allocation6], 256  }
  0x24   :  { %517 = vsyncadd [#allocation6], 4294967040 }
  0x25   :  { %518 = dma.done.wait [#allocation9], 256  }
  0x26   :  { %519 = vsyncadd [#allocation9], 4294967040  ;;  %v62_v0 = vld [vmem:[#allocation8] sm:$0xff]  ;;  %v44_v1 = vld [vmem:[#allocation5] sm:$0xff]  ;;  %v243_v30 = vlaneseq  ;;  %vm264_vm5 = vcmask 130048   ;;  %vm344_vm6 = vcmask 7168  }
  0x27   :  { %v63_v2 = vld [vmem:[#allocation8 + $0x8] sm:$0xff]  ;;  %v64_v3 = vmul.f32 %v62_v0, %v62_v0  ;;  %v46_v4 = vmul.f32 %v44_v1, %v44_v1  ;;  %v45_v5 = vld [vmem:[#allocation5 + $0x8] sm:$0xff]  ;;  %vm80_vm7 = vcmask 0   ;;  %s527_s6 = smov [#allocation10]  }
  0x28   :  { %v65_v6 = vmul.f32 %v63_v2, %v63_v2  ;;  %v47_v7 = vmul.f32 %v45_v5, %v45_v5  ;;  %v246_v31 = vshrl.u32 %v243_v30, 7  ;;  %v244_v32 = vand.u32 127, %v243_v30  ;;  %s370_s7 = sshll.u32 %s527_s6, 4  ;;  %s371_s7 = int_to_ptr.vmem [resolvable:$true] %s370_s7 }
  0x29   :  { %66 = vadd.xlane.f32.xlu1 %v64_v3  ;;  %48 = vadd.xlane.f32.xlu0 %v46_v4  ;;  %s494_s8 = scalar_lea.vmem %s371_s7, 16  ;;  %s498_s9 = scalar_lea.vmem %s371_s7, 32 }
  0x2a   :  { %v247_v33 = vadd.s32 8, %v246_v31  ;;  %vm253_vm1 = vcmp.ge.s32.totalorder %v244_v32, 16  ;;  %vm251_vm2 = vcmp.eq.s32.totalorder %v244_v32, %v246_v31  ;;  %p495_p2 = scmp.ne.s32.totalorder %s371_s7, %s494_s8  ;;  %p499_p3 = scmp.lt.s32.totalorder %s371_s7, %s371_s7 }
  0x2b   :  { %vm254_vm4 = vmor %vm251_vm2, %vm253_vm1  ;;  %p500_p4 = scmp.lt.s32.totalorder %s498_s9, %s494_s8 }
  0x2c   :  { %vm252_vm0 = vcmp.eq.s32.totalorder %v244_v32, %v247_v33 }
  0x2d   :  { %68 = vadd.xlane.f32.xlu1 %v65_v6  ;;  %50 = vadd.xlane.f32.xlu0 %v47_v7  ;;  %vm255_vm3 = vmor %vm252_vm0, %vm253_vm1  ;;  %p501_p5 = por %p500_p4, %p499_p3 }
  0x2f   :  { %p502_p6 = pnand %p501_p5, %p495_p2 }
  0xb6   :  { %v67_v8 = vpop.xlane.xlu1 %66  ;;  %v49_v9 = vpop.xlane.xlu0 %48 }
  0xb7   :  { %v70_v10 = vmax.f32 %v67_v8, 1e-24  ;;  %v52_v11 = vmax.f32 %v49_v9, 1e-24 }
  0xb9   :  { %422 = vrsqrt.f32 %v70_v10 }
  0xba   :  { %424 = vrsqrt.f32 %v52_v11  ;;  %v69_v12 = vpop.xlane.xlu1 %68  ;;  %v51_v13 = vpop.xlane.xlu0 %50 }
  0xbb   :  { %v71_v14 = vmax.f32 %v69_v12, 1e-24  ;;  %v53_v15 = vmax.f32 %v51_v13, 1e-24 }
  0xbd   :  { %426 = vrsqrt.f32 %v71_v14 }
  0xbe   :  { %428 = vrsqrt.f32 %v53_v15 }
  0xc3   :  { %v423_v16 = vpop.eup %422 }
  0xc4   :  { %v425_v17 = vpop.eup %424  ;;  %v74_v18 = vmul.f32 %v423_v16, %v62_v0 }
  0xc5   :  { %v56_v19 = vmul.f32 %v425_v17, %v44_v1 }
  0xc6   :  { %v76_v20 = vmul.f32 4.472136, %v74_v18 }
  0xc7   :  { %v427_v21 = vpop.eup %426  ;;  %v58_v22 = vmul.f32 4.472136, %v56_v19 }
  0xc8   :  { %v429_v23 = vpop.eup %428  ;;  %403 = vmatprep.mubr.f32.mxu1 %v76_v20  ;;  %v75_v24 = vmul.f32 %v427_v21, %v63_v2 }
  0xc9   :  { %396 = vmatprep.mubr.f32.mxu0 %v58_v22  ;;  %v57_v25 = vmul.f32 %v429_v23, %v45_v5 }
  0xca   :  { %v77_v26 = vmul.f32 4.472136, %v75_v24 }
  0xcb   :  { %v59_v27 = vmul.f32 4.472136, %v57_v25 }
  0xcc   :  { %v410_v28 = vpack.c.bf16 %v77_v26, %v76_v20 }
  0xcd   :  { %v406_v29 = vpack.c.bf16 %v59_v27, %v58_v22 }
  0xce   :  { %411 = vmatprep.subr.bf16.mxu1 %v410_v28 }
  0xcf   :  { %407 = vmatprep.subr.bf16.mxu0 %v406_v29  ;;  %413 = vmatpush3.bf16.xpose.msra.mxu1 %v410_v28 }
  0xd0   :  { %409 = vmatpush3.bf16.xpose.msra.mxu0 %v406_v29 }
  0xd6   :  { %404 = vmatmul.mubr.f32.vlgmr.msra.gmra.mrb[0].mxu1 %v77_v26 }
  0xd7   :  { %397 = vmatmul.mubr.f32.vlgmr.msra.gmra.mrb[0].mxu0 %v59_v27 }
 0x1a9   :  { %v405_v34 = vpop.f32.mrb[0].mxu1 }
 0x1aa   :  { %v398_v35 = vpop.f32.mrb[0].mxu0  ;;  %v234_v36 = vpop.f32.mrb[1].mxu1  ;;  %v383_v38 = vadd.f32 -1e+09, %v405_v34 }
 0x1ab   :  { %v381_v37 = vadd.f32 -1e+09, %v398_v35  ;;  %v157_v39 = vpop.f32.mrb[1].mxu0  ;;  %v382_v41 = vadd.f32 -1e+09, %v234_v36 }
 0x1ac   :  { %v380_v40 = vadd.f32 -1e+09, %v157_v39  ;;  %v573_v45 = vsel %vm255_vm3, %v383_v38, %v405_v34 }
 0x1ad   :  { %v567_v42 = vsel %vm255_vm3, %v381_v37, %v398_v35  ;;  %v577_v47 = vsel %vm254_vm4, %v382_v41, %v234_v36  ;;  %v292_v48 = vsel %vm264_vm5, %v573_v45, -inf }
 0x1ae   :  { %v569_v43 = vsel %vm254_vm4, %v380_v40, %v157_v39  ;;  %v268_v44 = vsel %vm264_vm5, %v567_v42, -inf  ;;  %v289_v49 = vsel %vm264_vm5, %v577_v47, -inf  ;;  %v322_v22 = vsub.f32 %v573_v45, %v567_v42 }
 0x1af   :  { %269 = vmax.xlane.f32.xlu1 %v268_v44  ;;  %v265_v46 = vsel %vm264_vm5, %v569_v43, -inf  ;;  %v321_v26 = vsub.f32 %v577_v47, %v569_v43 }
 0x1b0   :  { %266 = vmax.xlane.f32.xlu0 %v265_v46 }
 0x1b3   :  { %293 = vmax.xlane.f32.xlu1 %v292_v48 }
 0x1b4   :  { %290 = vmax.xlane.f32.xlu0 %v289_v49 }
 0x23c   :  { %v270_v50 = vpop.xlane.xlu1 %269 }
 0x23d   :  { %v272_v51 = vsub.f32 %v567_v42, %v270_v50  ;;  %v267_v52 = vpop.xlane.xlu0 %266 }
 0x23e   :  { %v271_v53 = vsub.f32 %v569_v43, %v267_v52  ;;  %v526_v43 = vmov 0.0  }
 0x23f   :  { %v275_v54 = vmul.f32 1.442695, %v272_v51  ;;  %81 = vst.msk [vmem:[#allocation4] sm:$0x1] %vm80_vm7, %v526_v43 }
 0x240   :  { %v273_v55 = vmul.f32 1.442695, %v271_v53  ;;  %v294_v56 = vpop.xlane.xlu1 %293 }
 0x241   :  { %430 = vpow2.f32 %v275_v54  ;;  %v296_v57 = vsub.f32 %v573_v45, %v294_v56  ;;  %v291_v58 = vpop.xlane.xlu0 %290 }
 0x242   :  { %432 = vpow2.f32 %v273_v55  ;;  %v295_v59 = vsub.f32 %v577_v47, %v291_v58 }
 0x243   :  { %v299_v60 = vmul.f32 1.442695, %v296_v57 }
 0x244   :  { %v297_v61 = vmul.f32 1.442695, %v295_v59 }
 0x245   :  { %434 = vpow2.f32 %v299_v60 }
 0x246   :  { %436 = vpow2.f32 %v297_v61  ;;  %v341_v51 = vld [vmem:[#allocation4] sm:$0x1] }
 0x24b   :  { %v431_v62 = vpop.eup %430 }
 0x24c   :  { %v433_v63 = vpop.eup %432  ;;  %v280_v0 = vsel %vm264_vm5, %v431_v62, 0.0 }
 0x24d   :  { %281 = vadd.xlane.f32.xlu1 %v280_v0  ;;  %v277_v1 = vsel %vm264_vm5, %v433_v63, 0.0 }
 0x24e   :  { %278 = vadd.xlane.f32.xlu0 %v277_v1 }
 0x24f   :  { %v435_v2 = vpop.eup %434 }
 0x250   :  { %v437_v3 = vpop.eup %436  ;;  %v304_v4 = vsel %vm264_vm5, %v435_v2, 0.0 }
 0x251   :  { %305 = vadd.xlane.f32.xlu1 %v304_v4  ;;  %v301_v5 = vsel %vm264_vm5, %v437_v3, 0.0 }
 0x252   :  { %302 = vadd.xlane.f32.xlu0 %v301_v5 }
 0x2da   :  { %v282_v6 = vpop.xlane.xlu1 %281 }
 0x2db   :  { %438 = vlog2.f32 %v282_v6  ;;  %v279_v7 = vpop.xlane.xlu0 %278 }
 0x2dc   :  { %440 = vlog2.f32 %v279_v7 }
 0x2de   :  { %v306_v8 = vpop.xlane.xlu1 %305 }
 0x2df   :  { %v303_v9 = vpop.xlane.xlu0 %302  ;;  %442 = vlog2.f32 %v306_v8 }
 0x2e0   :  { %444 = vrcp.f32 %v306_v8 }
 0x2e1   :  { %446 = vlog2.f32 %v303_v9 }
 0x2e2   :  { %448 = vrcp.f32 %v303_v9 }
 0x2e5   :  { %v439_v10 = vpop.eup %438 }
 0x2e6   :  { %v441_v11 = vpop.eup %440  ;;  %v286_v12 = vmul.f32 0.6931472, %v439_v10 }
 0x2e7   :  { %v284_v13 = vmul.f32 0.6931472, %v441_v11 }
 0x2e8   :  { %v288_v14 = vadd.f32 %v286_v12, %v270_v50 }
 0x2e9   :  { %v287_v15 = vadd.f32 %v284_v13, %v267_v52  ;;  %v443_v16 = vpop.eup %442 }
 0x2ea   :  { %v314_v17 = vsub.f32 %v288_v14, %v294_v56  ;;  %v445_v18 = vpop.eup %444  ;;  %v318_v20 = vmul.f32 0.6931472, %v443_v16 }
 0x2eb   :  { %v313_v19 = vsub.f32 %v287_v15, %v291_v58  ;;  %v447_v21 = vpop.eup %446  ;;  %v312_v27 = vmul.f32 %v445_v18, %v435_v2 }
 0x2ec   :  { %v316_v23 = vmul.f32 0.6931472, %v447_v21  ;;  %v320_v24 = vsub.f32 %v314_v17, %v318_v20  ;;  %v449_v25 = vpop.eup %448 }
 0x2ed   :  { %v311_v31 = vmul.f32 %v449_v25, %v437_v3 }
 0x2ee   :  { %v324_v28 = vadd.f32 %v322_v22, %v320_v24  ;;  %v319_v29 = vsub.f32 %v313_v19, %v316_v23 }
 0x2f0   :  { %v326_v30 = vmul.f32 %v324_v28, %v312_v27  ;;  %v323_v32 = vadd.f32 %v321_v26, %v319_v29 }
 0x2f2   :  { %v330_v33 = vsel %vm264_vm5, %v326_v30, 0.0  ;;  %v325_v34 = vmul.f32 %v323_v32, %v311_v31 }
 0x2f3   :  { %331 = vadd.xlane.f32.xlu1 %v330_v33 }
 0x2f4   :  { %v327_v35 = vsel %vm264_vm5, %v325_v34, 0.0 }
 0x2f5   :  { %328 = vadd.xlane.f32.xlu0 %v327_v35 }
 0x380   :  { %v332_v36 = vpop.xlane.xlu1 %331 }
 0x381   :  { %v343_v37 = vmul.f32 0.5, %v332_v36 }
 0x382   :  { %v329_v38 = vpop.xlane.xlu0 %328 }
 0x383   :  { %v346_v39 = vsel %vm344_vm6, %v343_v37, 0.0  ;;  %v342_v40 = vmul.f32 0.5, %v329_v38 }
 0x385   :  { %v345_v41 = vsel %vm344_vm6, %v342_v40, 0.0 }
 0x386   :  { %v347_v42 = vadd.f32 %v346_v39, %v345_v41 }
 0x388   :  { %348 = vadd.xlane.f32.xlu0 %v347_v42 }
 0x415   :  { %v349_v44 = vpop.xlane.xlu0 %348 }
 0x416   :  { %v350_v45 = vrot.slane %v349_v44, 4 }
 0x418   :  { %v351_v46 = vadd.f32 %v350_v45, %v349_v44 }
 0x41a   :  { %v352_v47 = vrot.slane %v351_v46, 2 }
 0x41c   :  { %v353_v48 = vadd.f32 %v352_v47, %v351_v46 }
 0x41e   :  { %v354_v49 = vrot.slane %v353_v48, 1 }
 0x420   :  { %v355_v50 = vadd.f32 %v354_v49, %v353_v48 }
 0x422   :  { %414 = vpush %v355_v50 }
 0x453   :  { %s415_s1 = spop %414 }
 0x454   :  { %v357_v52 = vstv %s415_s1 }
 0x455   :  { %v358_v53 = vadd.f32 %v357_v52, %v341_v51 }
 0x457   :  { %360 = vst.msk [vmem:[#allocation4] sm:$0x1] %vm80_vm7, %v358_v53 }
 0x45e   :  { %v361_v54 = vld [vmem:[#allocation4] sm:$0x1] }
 0x45f   :  { %v362_v55 = vmul.f32 0.00078125, %v361_v54 }
 0x461   :  { %363 = vst.msk [vmem:[#allocation10] sm:$0x1] %vm80_vm7, %v362_v55 }
 0x462   :  { %505 = shalt.err (!%p502_p6)
}
 0x463   :  { %s506_s12 = scalar_lea.hbm %s614_s2, 16 }
 0x464   :  { %p507_p7 = scmp.ne.s32.totalorder %s614_s2, %s506_s12  ;;  %p510_p8 = scmp.lt.u32.totalorder %s506_s12, %s614_s2 }
 0x466   :  { %p512_p9 = pnand %p510_p8, %p507_p7 }
 0x468   :  { %515 = shalt.err (!%p512_p9)
}
 0x469   :  { %373 = dma.vmem_to_hbm [thread:$0]  %s371_s7, 16, %s614_s2, [#allocation7]  }
 0x46a   :  { %520 = dma.done.wait [#allocation7], 16  }
 0x46b   :  { %521 = vsyncadd [#allocation7], 4294967280 }
 0x46c   :  { %377 = vsyncpa [#allocation6], 1 }
 0x46d   :  { %378 = vsyncpa [#allocation9], 1 }
 0x46e   :  { %379 = vsyncpa [#allocation7], 1 }

</bundles_post_ra>
